<compile_context>
chip_gen: v7x
topology: tpu7x:2x2x1
jax: 0.10.0
libtpu: 0.0.40
codegen_flags: <defaults>
</compile_context>

<pallas_src>
import jax
import jax.numpy as jnp
from jax.experimental import pallas as pl
from jax.experimental.pallas import tpu as pltpu

ALPHA = 0.3
BETA = 0.2


def uet_kernel(slab_ref, lp_ref, nb_ref, loss_ref, refined_ref):
    B, C = refined_ref.shape            # (128, 16)
    N = nb_ref.shape[1]                 # 8
    K = lp_ref.shape[0] // C            # 4

    # ---- static slices out of the packed slab (zero-cost views -> loads)
    lg = slab_ref[0:C, :]                                # (C, B)  logits_g
    aff = slab_ref[C:C + N, :]                           # (N, B)  aff_score
    ca = slab_ref[C + N:C + N + K, :]                    # (K, B)  ca_score
    tgt = slab_ref[C + N + K:C + N + K + 1, :]           # (1, B)  targets (as f32)

    # ---- softmax(neighbours) over classes (sublane axis 0) -> (C, N)
    nb = nb_ref[...]
    nb = nb - jnp.max(nb, axis=0, keepdims=True)
    pn = jnp.exp(nb)
    pn = pn / jnp.sum(pn, axis=0, keepdims=True)

    # ---- ensembled neighbour preds: (C, N) @ (N, B) -> (C, B)
    # Issued before the K-loop so MXU drain hides under the peer-softmax work.
    ens_n = jnp.dot(pn, aff, preferred_element_type=jnp.float32)

    # ---- wc = softmax(ca_score) over K (sublane axis 0) -> (K, B)
    ca = ca - jnp.max(ca, axis=0, keepdims=True)
    wc = jnp.exp(ca)
    wc = wc / jnp.sum(wc, axis=0, keepdims=True)

    # ---- ensembled peer preds: unrolled FMA over K (no (K,B,C) temp)
    ens_p = jnp.zeros((C, B), jnp.float32)
    for k in range(K):
        lp = lp_ref[k * C:(k + 1) * C, :]                # (C, B)
        lp = lp - jnp.max(lp, axis=0, keepdims=True)
        pp = jnp.exp(lp)
        pp = pp / jnp.sum(pp, axis=0, keepdims=True)
        ens_p = ens_p + pp * wc[k:k + 1, :]              # (C,B) * (1,B)

    # ---- one-hot targets (scatter_ equivalent), (C, B)
    cls = jax.lax.broadcasted_iota(jnp.int32, (C, B), 0).astype(jnp.float32)
    onehot = (cls == tgt).astype(jnp.float32)

    # ---- refined soft targets
    refined = (1.0 - ALPHA - BETA) * onehot + ALPHA * ens_p + BETA * ens_n

    # ---- log_softmax(logits_g) over classes (sublane axis 0)
    m = jnp.max(lg, axis=0, keepdims=True)
    lse = jnp.log(jnp.sum(jnp.exp(lg - m), axis=0, keepdims=True)) + m
    logp = lg - lse

    # ---- loss = mean over B of per-sample NLL (fully reduced in-kernel)
    nll = jnp.sum(-refined * logp, axis=0, keepdims=True)            # (1, B)
    loss_ref[...] = jnp.sum(nll, axis=1, keepdims=True) * (1.0 / B)  # (1, 1)

    # ---- refined targets stored directly in torch layout (B, C): one XLU vxpose
    refined_ref[...] = refined.T


def uet_forward(logits_g, logits_p, neighbours, targets, aff_score, ca_score):
    """Torch-layout inputs: logits_g (B,C) f32, logits_p (B,C,K) f32,
    neighbours (N,C) f32, targets (B,) int, aff_score (B,N) f32, ca_score (B,K) f32."""
    B, C = logits_g.shape
    K = logits_p.shape[2]
    N = neighbours.shape[0]
    # The torch module hard-codes 32/64/96 batch slicing and the in-kernel
    # cross-lane mean assumes full lane occupancy -> require B == 128.
    assert B == 128, "UET kernel assumes B == 128 (as the torch module does)"

    # Single combined relayout pass: B goes to the lane axis of every operand,
    # packed into one (C+N+K+1, B) slab plus a (K*C, B) logits_p slab.
    # TODO(synk): if the upstream producer can emit these layouts directly, drop this fusion.
    lg_cb = logits_g.astype(jnp.float32).T                              # (C, B)
    aff_nb = aff_score.astype(jnp.float32).T                            # (N, B)
    ca_kb = ca_score.astype(jnp.float32).T                              # (K, B)
    tgt_1b = targets.astype(jnp.float32).reshape(1, B)                  # (1, B) (small ints exact in f32)
    slab = jnp.concatenate([lg_cb, aff_nb, ca_kb, tgt_1b], axis=0)      # (C+N+K+1, B)
    lp_kcb = jnp.transpose(logits_p.astype(jnp.float32), (2, 1, 0))     # (K, C, B)
    lp_slab = lp_kcb.reshape(K * C, B)                                  # (K*C, B)
    nb_cn = neighbours.astype(jnp.float32).T                            # (C, N)

    in_bytes = 4 * (slab.size + lp_slab.size + nb_cn.size)
    out_bytes = 4 * (1 + B * C)
    cost = pl.CostEstimate(
        flops=2 * C * N * B + 12 * K * C * B + 14 * C * B,
        transcendentals=K * C * B + C * B + C * N + K * B,
        bytes_accessed=in_bytes + out_bytes,
    )

    vmem = pltpu.MemorySpace.VMEM
    loss_out, refined = pl.pallas_call(
        uet_kernel,
        out_shape=(
            jax.ShapeDtypeStruct((1, 1), jnp.float32),
            jax.ShapeDtypeStruct((B, C), jnp.float32),
        ),
        in_specs=[pl.BlockSpec(memory_space=vmem)] * 3,
        out_specs=(
            pl.BlockSpec(memory_space=vmem),
            pl.BlockSpec(memory_space=vmem),
        ),
        cost_estimate=cost,
    )(slab, lp_slab, nb_cn)

    return loss_out[0, 0], refined


def uet_ref(logits_g, logits_p, neighbours, targets, aff_score, ca_score):
    # pure-JAX reference of the torch forward (B assumed 128 by the torch chunking)
    C = logits_g.shape[1]
    onehot = jax.nn.one_hot(targets, C, dtype=jnp.float32)
    pn = jax.nn.softmax(neighbours, axis=1)
    ens_n = aff_score @ pn
    wc = jax.nn.softmax(ca_score, axis=1)
    pp = jax.nn.softmax(logits_p, axis=1)
    ens_p = jnp.sum(pp * wc[:, None, :], axis=2)
    refined = (1.0 - ALPHA - BETA) * onehot + ALPHA * ens_p + BETA * ens_n
    logp = jax.nn.log_softmax(logits_g, axis=1)
    loss = jnp.mean(jnp.sum(-refined * logp, axis=1))
    return loss, refined


if __name__ == "__main__":
    # B must be 128: the torch module hard-codes slicing the batch at 32/64/96.
    B, C, N, K = 128, 16, 8, 4

    key = jax.random.PRNGKey(0)
    k1, k2, k3, k4, k5, k6 = jax.random.split(key, 6)
    logits_g = jax.random.normal(k1, (B, C), dtype=jnp.float32)
    logits_p = jax.random.normal(k2, (B, C, K), dtype=jnp.float32)
    neighbours = jax.random.normal(k3, (N, C), dtype=jnp.float32)
    targets = jax.random.randint(k4, (B,), 0, C, dtype=jnp.int32)
    aff_score = jax.nn.softmax(jax.random.normal(k5, (B, N), dtype=jnp.float32), axis=1)
    ca_score = jax.random.normal(k6, (B, K), dtype=jnp.float32)

    loss, refined = uet_forward(logits_g, logits_p, neighbours, targets,
                                aff_score, ca_score)
    jax.block_until_ready((loss, refined))

    loss_ref, refined_ref = uet_ref(logits_g, logits_p, neighbours, targets,
                                    aff_score, ca_score)
    # exact reciprocals now -> tight tolerances
    assert jnp.allclose(loss, loss_ref, atol=1e-5, rtol=1e-5), (loss, loss_ref)
    assert jnp.allclose(refined, refined_ref, atol=1e-5, rtol=1e-5)

    print("KERNEL_OK")
</pallas_src>

<mosaic_0001>
module attributes {stable_mosaic.version = 11 : i64} {
  func.func @uet_kernel(%arg0: memref<29x128xf32, #tpu.memory_space<vmem>>, %arg1: memref<64x128xf32, #tpu.memory_space<vmem>>, %arg2: memref<16x8xf32, #tpu.memory_space<vmem>>, %arg3: memref<1x1xf32, #tpu.memory_space<vmem>>, %arg4: memref<128x16xf32, #tpu.memory_space<vmem>>) attributes {dimension_semantics = [], scalar_prefetch = 0 : i64, scratch_operands = 0 : i64, tpu.core_type = #tpu.core_type<tc>} {
    %c0 = arith.constant 0 : index
    %c0_0 = arith.constant 0 : index
    %0 = vector.load %arg0[%c0, %c0_0] : memref<29x128xf32, #tpu.memory_space<vmem>>, vector<16x128xf32>
    %c16 = arith.constant 16 : index
    %c0_1 = arith.constant 0 : index
    %1 = vector.load %arg0[%c16, %c0_1] : memref<29x128xf32, #tpu.memory_space<vmem>>, vector<8x128xf32>
    %c24 = arith.constant 24 : index
    %c0_2 = arith.constant 0 : index
    %2 = vector.load %arg0[%c24, %c0_2] : memref<29x128xf32, #tpu.memory_space<vmem>>, vector<4x128xf32>
    %c28 = arith.constant 28 : index
    %c0_3 = arith.constant 0 : index
    %3 = vector.load %arg0[%c28, %c0_3] : memref<29x128xf32, #tpu.memory_space<vmem>>, vector<1x128xf32>
    %c0_4 = arith.constant 0 : index
    %c0_5 = arith.constant 0 : index
    %4 = vector.load %arg2[%c0_4, %c0_5] : memref<16x8xf32, #tpu.memory_space<vmem>>, vector<16x8xf32>
    %cst = arith.constant dense<0xFF800000> : vector<8xf32>
    %5 = vector.multi_reduction <maximumf>, %4, %cst [0] : vector<16x8xf32> to vector<8xf32>
    %6 = vector.shape_cast %5 : vector<8xf32> to vector<1x8xf32>
    %7 = vector.broadcast %6 : vector<1x8xf32> to vector<16x8xf32>
    %8 = arith.subf %4, %7 : vector<16x8xf32>
    %9 = math.exp %8 : vector<16x8xf32>
    %cst_6 = arith.constant dense<0.000000e+00> : vector<8xf32>
    %10 = vector.multi_reduction <add>, %9, %cst_6 [0] : vector<16x8xf32> to vector<8xf32>
    %11 = vector.shape_cast %10 : vector<8xf32> to vector<1x8xf32>
    %12 = vector.broadcast %11 : vector<1x8xf32> to vector<16x8xf32>
    %13 = arith.divf %9, %12 : vector<16x8xf32>
    %cst_7 = arith.constant dense<0.000000e+00> : vector<16x128xf32>
    %14 = tpu.matmul %13, %1, %cst_7 {dimension_numbers = #tpu.dot_dimension_numbers<[1], [0], [0], [1], [0, 0, 1, 1], [], []>} : vector<16x8xf32>, vector<8x128xf32>, vector<16x128xf32> -> vector<16x128xf32>
    %cst_8 = arith.constant dense<0xFF800000> : vector<128xf32>
    %15 = vector.multi_reduction <maximumf>, %2, %cst_8 [0] : vector<4x128xf32> to vector<128xf32>
    %16 = vector.shape_cast %15 : vector<128xf32> to vector<1x128xf32>
    %17 = vector.broadcast %16 : vector<1x128xf32> to vector<4x128xf32>
    %18 = arith.subf %2, %17 : vector<4x128xf32>
    %19 = math.exp %18 : vector<4x128xf32>
    %cst_9 = arith.constant dense<0.000000e+00> : vector<128xf32>
    %20 = vector.multi_reduction <add>, %19, %cst_9 [0] : vector<4x128xf32> to vector<128xf32>
    %21 = vector.shape_cast %20 : vector<128xf32> to vector<1x128xf32>
    %22 = vector.broadcast %21 : vector<1x128xf32> to vector<4x128xf32>
    %23 = arith.divf %19, %22 : vector<4x128xf32>
    %cst_10 = arith.constant 0.000000e+00 : f32
    %24 = vector.broadcast %cst_10 : f32 to vector<16x128xf32>
    %c0_11 = arith.constant 0 : index
    %c0_12 = arith.constant 0 : index
    %25 = vector.load %arg1[%c0_11, %c0_12] : memref<64x128xf32, #tpu.memory_space<vmem>>, vector<16x128xf32>
    %cst_13 = arith.constant dense<0xFF800000> : vector<128xf32>
    %26 = vector.multi_reduction <maximumf>, %25, %cst_13 [0] : vector<16x128xf32> to vector<128xf32>
    %27 = vector.shape_cast %26 : vector<128xf32> to vector<1x128xf32>
    %28 = vector.broadcast %27 : vector<1x128xf32> to vector<16x128xf32>
    %29 = arith.subf %25, %28 : vector<16x128xf32>
    %30 = math.exp %29 : vector<16x128xf32>
    %cst_14 = arith.constant dense<0.000000e+00> : vector<128xf32>
    %31 = vector.multi_reduction <add>, %30, %cst_14 [0] : vector<16x128xf32> to vector<128xf32>
    %32 = vector.shape_cast %31 : vector<128xf32> to vector<1x128xf32>
    %33 = vector.broadcast %32 : vector<1x128xf32> to vector<16x128xf32>
    %34 = arith.divf %30, %33 : vector<16x128xf32>
    %35 = vector.extract_strided_slice %23 {offsets = [0, 0], sizes = [1, 128], strides = [1, 1]} : vector<4x128xf32> to vector<1x128xf32>
    %36 = vector.broadcast %35 : vector<1x128xf32> to vector<16x128xf32>
    %37 = arith.mulf %34, %36 : vector<16x128xf32>
    %38 = arith.addf %24, %37 : vector<16x128xf32>
    %c16_15 = arith.constant 16 : index
    %c0_16 = arith.constant 0 : index
    %39 = vector.load %arg1[%c16_15, %c0_16] : memref<64x128xf32, #tpu.memory_space<vmem>>, vector<16x128xf32>
    %cst_17 = arith.constant dense<0xFF800000> : vector<128xf32>
    %40 = vector.multi_reduction <maximumf>, %39, %cst_17 [0] : vector<16x128xf32> to vector<128xf32>
    %41 = vector.shape_cast %40 : vector<128xf32> to vector<1x128xf32>
    %42 = vector.broadcast %41 : vector<1x128xf32> to vector<16x128xf32>
    %43 = arith.subf %39, %42 : vector<16x128xf32>
    %44 = math.exp %43 : vector<16x128xf32>
    %cst_18 = arith.constant dense<0.000000e+00> : vector<128xf32>
    %45 = vector.multi_reduction <add>, %44, %cst_18 [0] : vector<16x128xf32> to vector<128xf32>
    %46 = vector.shape_cast %45 : vector<128xf32> to vector<1x128xf32>
    %47 = vector.broadcast %46 : vector<1x128xf32> to vector<16x128xf32>
    %48 = arith.divf %44, %47 : vector<16x128xf32>
    %49 = vector.extract_strided_slice %23 {offsets = [1, 0], sizes = [1, 128], strides = [1, 1]} : vector<4x128xf32> to vector<1x128xf32>
    %50 = vector.broadcast %49 : vector<1x128xf32> to vector<16x128xf32>
    %51 = arith.mulf %48, %50 : vector<16x128xf32>
    %52 = arith.addf %38, %51 : vector<16x128xf32>
    %c32 = arith.constant 32 : index
    %c0_19 = arith.constant 0 : index
    %53 = vector.load %arg1[%c32, %c0_19] : memref<64x128xf32, #tpu.memory_space<vmem>>, vector<16x128xf32>
    %cst_20 = arith.constant dense<0xFF800000> : vector<128xf32>
    %54 = vector.multi_reduction <maximumf>, %53, %cst_20 [0] : vector<16x128xf32> to vector<128xf32>
    %55 = vector.shape_cast %54 : vector<128xf32> to vector<1x128xf32>
    %56 = vector.broadcast %55 : vector<1x128xf32> to vector<16x128xf32>
    %57 = arith.subf %53, %56 : vector<16x128xf32>
    %58 = math.exp %57 : vector<16x128xf32>
    %cst_21 = arith.constant dense<0.000000e+00> : vector<128xf32>
    %59 = vector.multi_reduction <add>, %58, %cst_21 [0] : vector<16x128xf32> to vector<128xf32>
    %60 = vector.shape_cast %59 : vector<128xf32> to vector<1x128xf32>
    %61 = vector.broadcast %60 : vector<1x128xf32> to vector<16x128xf32>
    %62 = arith.divf %58, %61 : vector<16x128xf32>
    %63 = vector.extract_strided_slice %23 {offsets = [2, 0], sizes = [1, 128], strides = [1, 1]} : vector<4x128xf32> to vector<1x128xf32>
    %64 = vector.broadcast %63 : vector<1x128xf32> to vector<16x128xf32>
    %65 = arith.mulf %62, %64 : vector<16x128xf32>
    %66 = arith.addf %52, %65 : vector<16x128xf32>
    %c48 = arith.constant 48 : index
    %c0_22 = arith.constant 0 : index
    %67 = vector.load %arg1[%c48, %c0_22] : memref<64x128xf32, #tpu.memory_space<vmem>>, vector<16x128xf32>
    %cst_23 = arith.constant dense<0xFF800000> : vector<128xf32>
    %68 = vector.multi_reduction <maximumf>, %67, %cst_23 [0] : vector<16x128xf32> to vector<128xf32>
    %69 = vector.shape_cast %68 : vector<128xf32> to vector<1x128xf32>
    %70 = vector.broadcast %69 : vector<1x128xf32> to vector<16x128xf32>
    %71 = arith.subf %67, %70 : vector<16x128xf32>
    %72 = math.exp %71 : vector<16x128xf32>
    %cst_24 = arith.constant dense<0.000000e+00> : vector<128xf32>
    %73 = vector.multi_reduction <add>, %72, %cst_24 [0] : vector<16x128xf32> to vector<128xf32>
    %74 = vector.shape_cast %73 : vector<128xf32> to vector<1x128xf32>
    %75 = vector.broadcast %74 : vector<1x128xf32> to vector<16x128xf32>
    %76 = arith.divf %72, %75 : vector<16x128xf32>
    %77 = vector.extract_strided_slice %23 {offsets = [3, 0], sizes = [1, 128], strides = [1, 1]} : vector<4x128xf32> to vector<1x128xf32>
    %78 = vector.broadcast %77 : vector<1x128xf32> to vector<16x128xf32>
    %79 = arith.mulf %76, %78 : vector<16x128xf32>
    %80 = arith.addf %66, %79 : vector<16x128xf32>
    %81 = tpu.iota {dimensions = array<i32: 0>} : vector<16x128xi32>
    %82 = arith.sitofp %81 : vector<16x128xi32> to vector<16x128xf32>
    %83 = vector.broadcast %3 : vector<1x128xf32> to vector<16x128xf32>
    %84 = arith.cmpf oeq, %82, %83 : vector<16x128xf32>
    %85 = arith.extui %84 : vector<16x128xi1> to vector<16x128xi32>
    %86 = arith.sitofp %85 : vector<16x128xi32> to vector<16x128xf32>
    %cst_25 = arith.constant 5.000000e-01 : f32
    %87 = vector.broadcast %cst_25 : f32 to vector<16x128xf32>
    %88 = arith.mulf %87, %86 : vector<16x128xf32>
    %cst_26 = arith.constant 3.000000e-01 : f32
    %89 = vector.broadcast %cst_26 : f32 to vector<16x128xf32>
    %90 = arith.mulf %89, %80 : vector<16x128xf32>
    %91 = arith.addf %88, %90 : vector<16x128xf32>
    %cst_27 = arith.constant 2.000000e-01 : f32
    %92 = vector.broadcast %cst_27 : f32 to vector<16x128xf32>
    %93 = arith.mulf %92, %14 : vector<16x128xf32>
    %94 = arith.addf %91, %93 : vector<16x128xf32>
    %cst_28 = arith.constant dense<0xFF800000> : vector<128xf32>
    %95 = vector.multi_reduction <maximumf>, %0, %cst_28 [0] : vector<16x128xf32> to vector<128xf32>
    %96 = vector.shape_cast %95 : vector<128xf32> to vector<1x128xf32>
    %97 = vector.broadcast %96 : vector<1x128xf32> to vector<16x128xf32>
    %98 = arith.subf %0, %97 : vector<16x128xf32>
    %99 = math.exp %98 : vector<16x128xf32>
    %cst_29 = arith.constant dense<0.000000e+00> : vector<128xf32>
    %100 = vector.multi_reduction <add>, %99, %cst_29 [0] : vector<16x128xf32> to vector<128xf32>
    %101 = vector.shape_cast %100 : vector<128xf32> to vector<1x128xf32>
    %102 = math.log %101 : vector<1x128xf32>
    %103 = arith.addf %102, %96 : vector<1x128xf32>
    %104 = vector.broadcast %103 : vector<1x128xf32> to vector<16x128xf32>
    %105 = arith.subf %0, %104 : vector<16x128xf32>
    %cst_30 = arith.constant 0.000000e+00 : f32
    %106 = vector.broadcast %cst_30 : f32 to vector<16x128xf32>
    %107 = arith.subf %106, %94 : vector<16x128xf32>
    %108 = arith.mulf %107, %105 : vector<16x128xf32>
    %cst_31 = arith.constant dense<0.000000e+00> : vector<128xf32>
    %109 = vector.multi_reduction <add>, %108, %cst_31 [0] : vector<16x128xf32> to vector<128xf32>
    %110 = vector.shape_cast %109 : vector<128xf32> to vector<1x128xf32>
    %cst_32 = arith.constant dense<0.000000e+00> : vector<1xf32>
    %111 = vector.multi_reduction <add>, %110, %cst_32 [1] : vector<1x128xf32> to vector<1xf32>
    %112 = vector.shape_cast %111 : vector<1xf32> to vector<1x1xf32>
    %cst_33 = arith.constant 7.812500e-03 : f32
    %113 = vector.broadcast %cst_33 : f32 to vector<1x1xf32>
    %114 = arith.mulf %112, %113 : vector<1x1xf32>
    %c0_34 = arith.constant 0 : index
    %c0_35 = arith.constant 0 : index
    %115 = vector.load %arg3[%c0_34, %c0_35] : memref<1x1xf32, #tpu.memory_space<vmem>>, vector<1x1xf32>
    tpu.vector_store %arg3[%c0_34, %c0_35], %114 {strides = array<i32>} : memref<1x1xf32, #tpu.memory_space<vmem>>, vector<1x1xf32>,
    %116 = tpu.transpose %94, [1, 0] : vector<16x128xf32> -> vector<128x16xf32>
    %c0_36 = arith.constant 0 : index
    %c0_37 = arith.constant 0 : index
    %117 = vector.load %arg4[%c0_36, %c0_37] : memref<128x16xf32, #tpu.memory_space<vmem>>, vector<128x16xf32>
    tpu.vector_store %arg4[%c0_36, %c0_37], %116 {strides = array<i32>} : memref<128x16xf32, #tpu.memory_space<vmem>>, vector<128x16xf32>,
    return
  }
}

</mosaic_0001>

<bundles_post_ra>
// kernel: tpu_custom_call.1
= control target key start
LH: loop header
LB: loop body
LE: loop exit
PB: predicated region body
PF: predicated region fallthrough
CT: control target
= control target key end

     0   :  { %10 = vsyncpa [#allocation3], 0  ;;  %s775_s0 = inlined_call_operand.hbm [shape: f32[29,128], index: 0, kind: input, shape index: {}]   ;;  %s776_s1 = inlined_call_operand.hbm [shape: f32[64,128], index: 1, kind: input, shape index: {}]   ;;  %s777_s2 = inlined_call_operand.vmem [shape: f32[16,8], index: 2, kind: input, shape index: {}]   ;;  %s778_s3 = inlined_call_operand.hbm [shape: f32[1,1], index: 3, kind: output, shape index: {0}]   ;;  %s779_s4 = inlined_call_operand.vmem [shape: f32[128,16], index: 4, kind: output, shape index: {1}]  }
   0x1   :  { %11 = vsyncpa [#allocation6], 0 }
   0x2   :  { %12 = vsyncpa [#allocation4], 0  ;;  %s579_s15 = smov [#allocation2]   ;;  %s507_s19 = scalar_lea.hbm %s775_s0, 512 }
   0x3   :  { %s18_s16 = sshll.u32 %s579_s15, 4  ;;  %p508_p0 = scmp.ne.s32.totalorder %s775_s0, %s507_s19  ;;  %s19_s16 = int_to_ptr.vmem [resolvable:$true] %s18_s16 }
   0x4   :  { %p511_p1 = scmp.lt.u32.totalorder %s507_s19, %s775_s0 }
   0x6   :  { %p513_p2 = pnand %p511_p1, %p508_p0 }
   0x8   :  { %516 = shalt.err (!%p513_p2)
}
   0x9   :  { %s517_s24 = scalar_lea.vmem %s19_s16, 512  ;;  %p522_p4 = scmp.lt.s32.totalorder %s19_s16, %s19_s16 }
   0xa   :  { %p518_p3 = scmp.ne.s32.totalorder %s19_s16, %s517_s24  ;;  %p523_p5 = scmp.lt.s32.totalorder %s517_s24, %s517_s24 }
   0xc   :  { %p524_p6 = por %p523_p5, %p522_p4 }
   0xe   :  { %p525_p7 = pnand %p524_p6, %p518_p3 }
  0x10   :  { %528 = shalt.err (!%p525_p7)
}
  0x11   :  { %s580_s25 = smov 128   ;;  %s581_s26 = smov 8  }
  0x12   :  { %24 = dma.hbm_to_vmem [thread:$0]  %s775_s0, 512, %s19_s16, [#allocation3], %s580_s25, %s580_s25, %s581_s26  }
  0x13   :  { %s582_s29 = smov [#allocation5]   ;;  %s529_s7 = scalar_lea.hbm %s776_s1, 1024 }
  0x14   :  { %s30_s30 = sshll.u32 %s582_s29, 4  ;;  %p530_p8 = scmp.ne.s32.totalorder %s776_s1, %s529_s7  ;;  %s31_s30 = int_to_ptr.vmem [resolvable:$true] %s30_s30 }
  0x15   :  { %p533_p9 = scmp.lt.u32.totalorder %s529_s7, %s776_s1 }
  0x17   :  { %p535_p10 = pnand %p533_p9, %p530_p8 }
  0x19   :  { %538 = shalt.err (!%p535_p10)
}
  0x1a   :  { %s539_s12 = scalar_lea.vmem %s31_s30, 1024  ;;  %p544_p12 = scmp.lt.s32.totalorder %s31_s30, %s31_s30 }
  0x1b   :  { %p540_p11 = scmp.ne.s32.totalorder %s31_s30, %s539_s12  ;;  %p545_p13 = scmp.lt.s32.totalorder %s539_s12, %s539_s12 }
  0x1d   :  { %p546_p0 = por %p545_p13, %p544_p12 }
  0x1f   :  { %p547_p1 = pnand %p546_p0, %p540_p11 }
  0x21   :  { %550 = shalt.err (!%p547_p1)
}
  0x22   :  { %36 = dma.hbm_to_vmem [thread:$0]  %s776_s1, 1024, %s31_s30, [#allocation6], %s580_s25, %s580_s25, %s581_s26  }
  0x23   :  { %573 = dma.done.wait [#allocation3], 512  }
  0x24   :  { %574 = vsyncadd [#allocation3], 4294966784 }
  0x25   :  { %575 = dma.done.wait [#allocation6], 1024  }
  0x26   :  { %576 = vsyncadd [#allocation6], 4294966272  ;;  %vm52_vm0 = vcmask 64512   ;;  %v47_v0 = vld [vmem:[#allocation2 + $0x10] sm:$0xff]  ;;  %v50_v1 = vld [vmem:[%s777_s2] sm:$0xff]  ;;  %vm161_vm1 = vcmask 1043456  }
  0x27   :  { %v51_v2 = vld [vmem:[%s777_s2 + $0x8] sm:$0xff]  ;;  %456 = vmatprep.subr.mxu0 %v47_v0  ;;  %v53_v3 = vsel %vm52_vm0, %v50_v1, -inf  ;;  %v48_v30 = vld [vmem:[#allocation2 + $0x18] sm:$0xf]  ;;  %v181_v31 = vld [vmem:[#allocation5] sm:$0xff]  ;;  %s584_s1 = smov [#allocation7]  }
  0x28   :  { %v54_v4 = vsel %vm52_vm0, %v51_v2, -inf  ;;  %457 = vmatpush3.msra.mxu0 %v47_v0  ;;  %v182_v32 = vld [vmem:[#allocation5 + $0x8] sm:$0xff]  ;;  %v214_v33 = vld [vmem:[#allocation5 + $0x10] sm:$0xff]  ;;  %v215_v34 = vld [vmem:[#allocation5 + $0x18] sm:$0xff]  ;;  %v162_v35 = vsel %vm161_vm1, %v48_v30, -inf  ;;  %s434_s2 = sshll.u32 %s584_s1, 4  ;;  %s435_s2 = int_to_ptr.vmem [resolvable:$true] %s434_s2 }
  0x29   :  { %v55_v5 = vmax.f32 %v53_v3, %v54_v4  ;;  %v183_v36 = vmax.f32 %v181_v31, %v182_v32  ;;  %v216_v37 = vmax.f32 %v214_v33, %v215_v34  ;;  %v163_v38 = vrot.slane %v162_v35, 4  ;;  %v247_v39 = vld [vmem:[#allocation5 + $0x20] sm:$0xff]  ;;  %v248_v40 = vld [vmem:[#allocation5 + $0x28] sm:$0xff]  ;;  %v280_v45 = vld [vmem:[#allocation5 + $0x30] sm:$0xff]  ;;  %s551_s18 = scalar_lea.vmem %s435_s2, 16  ;;  %s555_s19 = scalar_lea.vmem %s435_s2, 32 }
  0x2a   :  { %v249_v43 = vmax.f32 %v247_v39, %v248_v40  ;;  %v281_v46 = vld [vmem:[#allocation5 + $0x38] sm:$0xff]  ;;  %v647_v61 = vld [vmem:[#allocation2] sm:$0xff]  ;;  %v649_v62 = vld [vmem:[#allocation2 + $0x8] sm:$0xff]  ;;  %vm377_vm4 = vcmask 0   ;;  %p552_p2 = scmp.ne.s32.totalorder %s435_s2, %s551_s18  ;;  %p556_p3 = scmp.lt.s32.totalorder %s435_s2, %s435_s2 }
  0x2b   :  { %v56_v6 = vrot.slane %v55_v5, 4  ;;  %v184_v41 = vrot.slane %v183_v36, 4  ;;  %v217_v42 = vrot.slane %v216_v37, 4  ;;  %v164_v44 = vmax.f32 %v162_v35, %v163_v38  ;;  %p557_p4 = scmp.lt.s32.totalorder %s555_s19, %s551_s18 }
  0x2c   :  { %v250_v49 = vrot.slane %v249_v43, 4  ;;  %v282_v50 = vmax.f32 %v280_v45, %v281_v46  ;;  %v338_v4 = vmax.f32 %v647_v61, %v649_v62 }
  0x2d   :  { %v57_v7 = vmax.f32 %v55_v5, %v56_v6  ;;  %v185_v47 = vmax.f32 %v183_v36, %v184_v41  ;;  %v218_v48 = vmax.f32 %v216_v37, %v217_v42  ;;  %v165_v51 = vrot.slane %v164_v44, 2  ;;  %p558_p5 = por %p557_p4, %p556_p3 }
  0x2e   :  { %v251_v54 = vmax.f32 %v249_v43, %v250_v49  ;;  %v283_v55 = vrot.slane %v282_v50, 4 }
  0x2f   :  { %v58_v8 = vrot.slane %v57_v7, 2  ;;  %v186_v52 = vrot.slane %v185_v47, 2  ;;  %v219_v53 = vrot.slane %v218_v48, 2  ;;  %v166_v56 = vmax.f32 %v164_v44, %v165_v51  ;;  %p559_p6 = pnand %p558_p5, %p552_p2 }
  0x30   :  { %v252_v59 = vrot.slane %v251_v54, 2  ;;  %v284_v60 = vmax.f32 %v282_v50, %v283_v55 }
  0x31   :  { %v59_v9 = vmax.f32 %v57_v7, %v58_v8  ;;  %v187_v57 = vmax.f32 %v185_v47, %v186_v52  ;;  %v220_v58 = vmax.f32 %v218_v48, %v219_v53  ;;  %v167_v63 = vrot.slane %v166_v56, 1 }
  0x32   :  { %v285_v3 = vrot.slane %v284_v60, 2 }
  0x33   :  { %v60_v10 = vrot.slane %v59_v9, 1  ;;  %v188_v0 = vrot.slane %v187_v57, 1  ;;  %v168_v5 = vmax.f32 %v166_v56, %v167_v63 }
  0x35   :  { %v61_v11 = vmax.f32 %v59_v9, %v60_v10  ;;  %v189_v6 = vmax.f32 %v187_v57, %v188_v0  ;;  %v286_v9 = vmax.f32 %v284_v60, %v285_v3  ;;  %v339_v10 = vrot.slane %v338_v4, 4 }
  0x37   :  { %v62_v12 = vsub.f32 %v50_v1, %v61_v11  ;;  %v63_v13 = vsub.f32 %v51_v2, %v61_v11  ;;  %v221_v1 = vrot.slane %v220_v58, 1  ;;  %v253_v2 = vmax.f32 %v251_v54, %v252_v59 }
  0x38   :  { %v169_v11 = vsub.f32 %v48_v30, %v168_v5 }
  0x39   :  { %v64_v14 = vmul.f32 1.442695, %v62_v12  ;;  %v66_v15 = vmul.f32 1.442695, %v63_v13  ;;  %v222_v7 = vmax.f32 %v220_v58, %v221_v1  ;;  %v254_v8 = vrot.slane %v253_v2, 1 }
  0x3a   :  { %v190_v12 = vsub.f32 %v181_v31, %v189_v6  ;;  %v191_v13 = vsub.f32 %v182_v32, %v189_v6 }
  0x3b   :  { %467 = vpow2.f32 %v64_v14  ;;  %v223_v14 = vsub.f32 %v214_v33, %v222_v7 }
  0x3c   :  { %469 = vpow2.f32 %v66_v15  ;;  %v255_v15 = vmax.f32 %v253_v2, %v254_v8 }
  0x45   :  { %v468_v16 = vpop.eup %467 }
  0x46   :  { %v470_v17 = vpop.eup %469  ;;  %v68_v18 = vsel %vm52_vm0, %v468_v16, 0.0 }
  0x47   :  { %v69_v19 = vsel %vm52_vm0, %v470_v17, 0.0 }
  0x48   :  { %v70_v20 = vadd.f32 %v69_v19, %v68_v18  ;;  %v170_v18 = vmul.f32 1.442695, %v169_v11  ;;  %v224_v19 = vsub.f32 %v215_v34, %v222_v7 }
  0x4a   :  { %v71_v21 = vrot.slane %v70_v20, 4 }
  0x4c   :  { %v72_v22 = vadd.f32 %v71_v21, %v70_v20  ;;  %v192_v20 = vmul.f32 1.442695, %v190_v12  ;;  %v194_v21 = vmul.f32 1.442695, %v191_v13 }
  0x4e   :  { %v73_v23 = vrot.slane %v72_v22, 2 }
  0x50   :  { %v74_v24 = vadd.f32 %v73_v23, %v72_v22  ;;  %v225_v22 = vmul.f32 1.442695, %v223_v14  ;;  %v256_v23 = vsub.f32 %v247_v39, %v255_v15 }
  0x52   :  { %v75_v25 = vrot.slane %v74_v24, 1 }
  0x54   :  { %v76_v26 = vadd.f32 %v75_v25, %v74_v24 }
  0x56   :  { %471 = vrcp.f32 %v76_v26  ;;  %v227_v26 = vmul.f32 1.442695, %v224_v19 }
  0x57   :  { %473 = vpow2.f32 %v170_v18 }
  0x58   :  { %475 = vpow2.f32 %v192_v20 }
  0x59   :  { %477 = vpow2.f32 %v194_v21 }
  0x5a   :  { %479 = vpow2.f32 %v225_v22 }
  0x5b   :  { %481 = vpow2.f32 %v227_v26 }
  0x60   :  { %v472_v27 = vpop.eup %471 }
  0x61   :  { %v78_v28 = vmul.f32 %v472_v27, %v468_v16  ;;  %v79_v29 = vmul.f32 %v472_v27, %v470_v17  ;;  %v287_v16 = vrot.slane %v286_v9, 1  ;;  %v340_v17 = vmax.f32 %v338_v4, %v339_v10  ;;  %v653_v36 = vpop.eup %473 }
  0x62   :  { %v257_v27 = vsub.f32 %v248_v40, %v255_v15  ;;  %v655_v37 = vpop.eup %475  ;;  %v172_v41 = vsel %vm161_vm1, %v653_v36, 0.0 }
  0x63   :  { %458 = vmatprep.mubr.msk.f32.mxu0 %vm52_vm0, %v78_v28  ;;  %v288_v24 = vmax.f32 %v286_v9, %v287_v16  ;;  %v341_v25 = vrot.slane %v340_v17, 2  ;;  %v258_v28 = vmul.f32 1.442695, %v256_v23  ;;  %v659_v39 = vpop.eup %477  ;;  %v173_v44 = vrot.slane %v172_v41, 4 }
  0x64   :  { %459 = vmatmul.mubr.msk.f32.vlgmr.msra.gmra.mrb[0].mxu0 %vm52_vm0, %v79_v29  ;;  %v260_v31 = vmul.f32 1.442695, %v257_v27  ;;  %v661_v40 = vpop.eup %479  ;;  %v206_v27 = vlaneseq }
  0x65   :  { %v289_v29 = vsub.f32 %v280_v45, %v288_v24  ;;  %v342_v30 = vmax.f32 %v340_v17, %v341_v25  ;;  %v290_v32 = vsub.f32 %v281_v46, %v288_v24  ;;  %483 = vpow2.f32 %v258_v28  ;;  %v665_v42 = vpop.eup %481 }
  0x66   :  { %485 = vpow2.f32 %v260_v31  ;;  %v196_v45 = vadd.f32 %v659_v39, %v655_v37  ;;  %v229_v48 = vadd.f32 %v665_v42, %v661_v40  ;;  %v174_v51 = vadd.f32 %v173_v44, %v172_v41 }
  0x67   :  { %v291_v33 = vmul.f32 1.442695, %v289_v29  ;;  %v343_v34 = vrot.slane %v342_v30, 1  ;;  %v293_v35 = vmul.f32 1.442695, %v290_v32  ;;  %v207_v31 = vshrl.u32 %v206_v27, 7 }
  0x68   :  { %v197_v52 = vrot.slane %v196_v45, 4  ;;  %v230_v55 = vrot.slane %v229_v48, 4  ;;  %v175_v58 = vrot.slane %v174_v51, 2 }
  0x69   :  { %487 = vpow2.f32 %v291_v33  ;;  %v657_v38 = vmax.f32 %v342_v30, %v343_v34  ;;  %v241_v41 = vsub.s32 1, %v207_v31  ;;  %v274_v44 = vsub.s32 2, %v207_v31 }
  0x6a   :  { %489 = vpow2.f32 %v293_v35  ;;  %v198_v59 = vadd.f32 %v197_v52, %v196_v45  ;;  %v231_v60 = vadd.f32 %v230_v55, %v229_v48  ;;  %v176_v1 = vadd.f32 %v175_v58, %v174_v51 }
  0x6b   :  { %v345_v43 = vsub.f32 %v647_v61, %v657_v38  ;;  %v346_v46 = vsub.f32 %v649_v62, %v657_v38  ;;  %v208_v35 = vsub.s32 0, %v207_v31 }
  0x6c   :  { %v199_v2 = vrot.slane %v198_v59, 2  ;;  %v232_v3 = vrot.slane %v231_v60, 2  ;;  %v177_v6 = vrot.slane %v176_v1, 1 }
  0x6d   :  { %v347_v50 = vmul.f32 1.442695, %v345_v43  ;;  %v349_v53 = vmul.f32 1.442695, %v346_v46 }
  0x6e   :  { %v200_v7 = vadd.f32 %v199_v2, %v198_v59  ;;  %v233_v9 = vadd.f32 %v232_v3, %v231_v60  ;;  %v178_v13 = vadd.f32 %v177_v6, %v176_v1  ;;  %v315_v3 = vadd.s32 8, %v207_v31 }
  0x6f   :  { %v673_v47 = vpop.eup %483  ;;  %491 = vpow2.f32 %v347_v50 }
  0x70   :  { %v677_v49 = vpop.eup %485  ;;  %493 = vpow2.f32 %v349_v53  ;;  %v201_v14 = vrot.slane %v200_v7, 1  ;;  %v234_v15 = vrot.slane %v233_v9, 1 }
  0x71   :  { %v262_v56 = vadd.f32 %v677_v49, %v673_v47  ;;  %495 = vrcp.f32 %v178_v13 }
  0x72   :  { %v202_v19 = vadd.f32 %v201_v14, %v200_v7  ;;  %v235_v20 = vadd.f32 %v234_v15, %v233_v9  ;;  %v450_v9 = vld [vmem:[#allocation2 + $0x1c] ss:$0 sm:$0xff]  ;;  %v583_v15 = vmov 0.0  }
  0x73   :  { %v679_v54 = vpop.eup %487  ;;  %v263_v63 = vrot.slane %v262_v56, 4 }
  0x74   :  { %v683_v57 = vpop.eup %489  ;;  %497 = vrcp.f32 %v202_v19 }
  0x75   :  { %v295_v0 = vadd.f32 %v683_v57, %v679_v54  ;;  %v264_v4 = vadd.f32 %v263_v63, %v262_v56  ;;  %499 = vrcp.f32 %v235_v20  ;;  %v307_v63 = vsub.s32 3, %v207_v31 }
  0x77   :  { %v296_v5 = vrot.slane %v295_v0, 4  ;;  %v265_v10 = vrot.slane %v264_v4, 2 }
  0x79   :  { %v492_v8 = vpop.eup %491  ;;  %v297_v11 = vadd.f32 %v296_v5, %v295_v0  ;;  %v266_v16 = vadd.f32 %v265_v10, %v264_v4 }
  0x7a   :  { %v494_v12 = vpop.eup %493 }
  0x7b   :  { %v298_v17 = vrot.slane %v297_v11, 2  ;;  %v351_v18 = vadd.f32 %v494_v12, %v492_v8  ;;  %v267_v21 = vrot.slane %v266_v16, 1  ;;  %v496_v30 = vpop.eup %495  ;;  %v317_v8 = vcvt.s32.f32 %v315_v3 }
  0x7c   :  { %v180_v34 = vmul.f32 %v496_v30, %v653_v36 }
  0x7d   :  { %v299_v22 = vadd.f32 %v298_v17, %v297_v11  ;;  %v352_v23 = vrot.slane %v351_v18, 4  ;;  %v268_v24 = vadd.f32 %v267_v21, %v266_v16  ;;  %vm323_vm2 = vcmp.eq.f32.partialorder %v317_v8, %v450_v9 }
  0x7e   :  { %v498_v33 = vpop.eup %497  ;;  %v209_v48 = vrot.slane %v180_v34, %v208_v35  ;;  %v242_v51 = vrot.slane %v180_v34, %v241_v41  ;;  %v275_v56 = vrot.slane %v180_v34, %v274_v44  ;;  %v308_v5 = vrot.slane %v180_v34, %v307_v63 }
  0x7f   :  { %v300_v25 = vrot.slane %v299_v22, 1  ;;  %v353_v26 = vadd.f32 %v352_v23, %v351_v18  ;;  %501 = vrcp.f32 %v268_v24  ;;  %v500_v43 = vpop.eup %499  ;;  %v205_v46 = vmul.f32 %v498_v33, %v659_v39 }
  0x80   :  { %v238_v50 = vmul.f32 %v500_v43, %v665_v42  ;;  %v204_v53 = vmul.f32 %v498_v33, %v655_v37  ;;  %v237_v55 = vmul.f32 %v500_v43, %v661_v40  ;;  %v452_v16 = vsel %vm323_vm2, 1.0, %v583_v15 }
  0x81   :  { %v301_v28 = vadd.f32 %v300_v25, %v299_v22  ;;  %v354_v29 = vrot.slane %v353_v26, 2  ;;  %v211_v59 = vmul.f32 %v209_v48, %v205_v46  ;;  %v329_v18 = vmul.f32 0.5, %v452_v16 }
  0x82   :  { %v244_v36 = vmul.f32 %v242_v51, %v238_v50  ;;  %v210_v1 = vmul.f32 %v209_v48, %v204_v53  ;;  %v243_v2 = vmul.f32 %v242_v51, %v237_v55 }
  0x83   :  { %503 = vrcp.f32 %v301_v28  ;;  %v355_v32 = vadd.f32 %v354_v29, %v353_v26 }
  0x84   :  { %v246_v42 = vadd.f32 %v244_v36, %v211_v59  ;;  %v245_v40 = vadd.f32 %v243_v2, %v210_v1 }
  0x85   :  { %v356_v45 = vrot.slane %v355_v32, 1 }
  0x87   :  { %v357_v58 = vadd.f32 %v356_v45, %v355_v32 }
  0x89   :  { %v502_v52 = vpop.eup %501  ;;  %505 = vlog2.f32 %v357_v58 }
  0x8a   :  { %v271_v60 = vmul.f32 %v502_v52, %v677_v49  ;;  %v270_v39 = vmul.f32 %v502_v52, %v673_v47  ;;  %v316_v49 = vcvt.s32.f32 %v207_v31 }
  0x8c   :  { %v277_v4 = vmul.f32 %v275_v56, %v271_v60  ;;  %v276_v6 = vmul.f32 %v275_v56, %v270_v39  ;;  %vm322_vm3 = vcmp.eq.f32.partialorder %v316_v49, %v450_v9 }
  0x8d   :  { %v504_v0 = vpop.eup %503 }
  0x8e   :  { %v304_v37 = vmul.f32 %v504_v0, %v683_v57  ;;  %v303_v7 = vmul.f32 %v504_v0, %v679_v54  ;;  %v279_v10 = vadd.f32 %v277_v4, %v246_v42  ;;  %v278_v12 = vadd.f32 %v276_v6, %v245_v40 }
  0x8f   :  { %v451_v57 = vsel %vm322_vm3, 1.0, %v583_v15 }
  0x90   :  { %v310_v11 = vmul.f32 %v308_v5, %v304_v37  ;;  %v309_v13 = vmul.f32 %v308_v5, %v303_v7  ;;  %v328_v21 = vmul.f32 0.5, %v451_v57 }
  0x92   :  { %v312_v47 = vadd.f32 %v310_v11, %v279_v10  ;;  %v311_v17 = vadd.f32 %v309_v13, %v278_v12 }
  0x93   :  { %v506_v14 = vpop.eup %505 }
  0x94   :  { %v331_v19 = vmul.f32 0.3, %v312_v47  ;;  %v359_v20 = vmul.f32 0.6931472, %v506_v14  ;;  %v330_v54 = vmul.f32 0.3, %v311_v17 }
  0x96   :  { %v333_v22 = vadd.f32 %v331_v19, %v329_v18  ;;  %v360_v23 = vadd.f32 %v359_v20, %v657_v38  ;;  %v332_v25 = vadd.f32 %v330_v54, %v328_v21 }
  0x98   :  { %v362_v30 = vsub.f32 %v649_v62, %v360_v23  ;;  %v361_v32 = vsub.f32 %v647_v61, %v360_v23 }
 0x137   :  { %v460_v24 = vpop.f32.mrb[0].mxu0 }
 0x138   :  { %v335_v26 = vmul.f32 0.2, %v460_v24  ;;  %v152_v27 = vpop.f32.mrb[1].mxu0 }
 0x139   :  { %v334_v28 = vmul.f32 0.2, %v152_v27 }
 0x13a   :  { %v337_v29 = vadd.f32 %v335_v26, %v333_v22 }
 0x13b   :  { %v336_v31 = vadd.f32 %v334_v28, %v332_v25 }
 0x13c   :  { %v364_v33 = vsub.f32 0.0, %v337_v29 }
 0x13d   :  { %v363_v34 = vsub.f32 0.0, %v336_v31 }
 0x13e   :  { %v366_v35 = vmul.f32 %v364_v33, %v362_v30 }
 0x13f   :  { %v365_v41 = vmul.f32 %v363_v34, %v361_v32 }
 0x141   :  { %v367_v43 = vadd.f32 %v366_v35, %v365_v41 }
 0x143   :  { %v368_v44 = vrot.slane %v367_v43, 4 }
 0x145   :  { %v369_v45 = vadd.f32 %v368_v44, %v367_v43 }
 0x147   :  { %v370_v46 = vrot.slane %v369_v45, 2 }
 0x149   :  { %v371_v38 = vadd.f32 %v370_v46, %v369_v45 }
 0x14b   :  { %v372_v48 = vrot.slane %v371_v38, 1 }
 0x14d   :  { %v373_v50 = vadd.f32 %v372_v48, %v371_v38 }
 0x14f   :  { %374 = vadd.xlane.f32.xlu0 %v373_v50 }
 0x17c   :  { %379 = vxpose.xlu0.b32.start [1/2] (short) %v336_v31, 128 }
 0x180   :  { %380 = vxpose.xlu0.b32.end [2/2] (short) %v337_v29, 128 }
 0x1dc   :  { %v375_v62 = vpop.xlane.xlu0 %374 }
 0x1dd   :  { %v376_v51 = vmul.f32 0.0078125, %v375_v62 }
 0x1df   :  { %378 = vst.msk [vmem:[#allocation7] sm:$0x1] %vm377_vm4, %v376_v51 }
 0x1e0   :  { %562 = shalt.err (!%p559_p6)
}
 0x1e1   :  { %s563_s22 = scalar_lea.hbm %s778_s3, 16 }
 0x1e2   :  { %p564_p7 = scmp.ne.s32.totalorder %s778_s3, %s563_s22  ;;  %p567_p8 = scmp.lt.u32.totalorder %s563_s22, %s778_s3 }
 0x1e4   :  { %p569_p9 = pnand %p567_p8, %p564_p7 }
 0x1e6   :  { %572 = shalt.err (!%p569_p9)
}
 0x1e7   :  { %437 = dma.vmem_to_hbm [thread:$0]  %s435_s2, 16, %s778_s3, [#allocation4]   ;;  %vm411_vm5 = vcmask 130048  }
 0x1fc   :  { %v395_v61 = vpop.trf.xlu0 }
 0x1fd   :  { %412 = vst.msk [vmem:[%s779_s4] sm:$0xff] %vm411_vm5, %v395_v61 }
 0x200   :  { %v396_v52 = vpop.trf.xlu0 }
 0x201   :  { %413 = vst.msk [vmem:[%s779_s4 + $0x8] sm:$0xff] %vm411_vm5, %v396_v52 }
 0x204   :  { %v397_v53 = vpop.trf.xlu0 }
 0x205   :  { %414 = vst.msk [vmem:[%s779_s4 + $0x10] sm:$0xff] %vm411_vm5, %v397_v53 }
 0x208   :  { %v398_v55 = vpop.trf.xlu0 }
 0x209   :  { %415 = vst.msk [vmem:[%s779_s4 + $0x18] sm:$0xff] %vm411_vm5, %v398_v55 }
 0x20c   :  { %v399_v56 = vpop.trf.xlu0 }
 0x20d   :  { %416 = vst.msk [vmem:[%s779_s4 + $0x20] sm:$0xff] %vm411_vm5, %v399_v56 }
 0x210   :  { %v400_v58 = vpop.trf.xlu0 }
 0x211   :  { %417 = vst.msk [vmem:[%s779_s4 + $0x28] sm:$0xff] %vm411_vm5, %v400_v58 }
 0x214   :  { %v401_v59 = vpop.trf.xlu0 }
 0x215   :  { %418 = vst.msk [vmem:[%s779_s4 + $0x30] sm:$0xff] %vm411_vm5, %v401_v59 }
 0x218   :  { %v402_v36 = vpop.trf.xlu0 }
 0x219   :  { %419 = vst.msk [vmem:[%s779_s4 + $0x38] sm:$0xff] %vm411_vm5, %v402_v36 }
 0x21c   :  { %v403_v60 = vpop.trf.xlu0 }
 0x21d   :  { %420 = vst.msk [vmem:[%s779_s4 + $0x40] sm:$0xff] %vm411_vm5, %v403_v60 }
 0x220   :  { %v404_v63 = vpop.trf.xlu0 }
 0x221   :  { %421 = vst.msk [vmem:[%s779_s4 + $0x48] sm:$0xff] %vm411_vm5, %v404_v63 }
 0x224   :  { %v405_v0 = vpop.trf.xlu0 }
 0x225   :  { %422 = vst.msk [vmem:[%s779_s4 + $0x50] sm:$0xff] %vm411_vm5, %v405_v0 }
 0x228   :  { %v406_v1 = vpop.trf.xlu0 }
 0x229   :  { %423 = vst.msk [vmem:[%s779_s4 + $0x58] sm:$0xff] %vm411_vm5, %v406_v1 }
 0x22c   :  { %v407_v2 = vpop.trf.xlu0 }
 0x22d   :  { %424 = vst.msk [vmem:[%s779_s4 + $0x60] sm:$0xff] %vm411_vm5, %v407_v2 }
 0x230   :  { %v408_v39 = vpop.trf.xlu0 }
 0x231   :  { %425 = vst.msk [vmem:[%s779_s4 + $0x68] sm:$0xff] %vm411_vm5, %v408_v39 }
 0x234   :  { %v409_v3 = vpop.trf.xlu0 }
 0x235   :  { %426 = vst.msk [vmem:[%s779_s4 + $0x70] sm:$0xff] %vm411_vm5, %v409_v3 }
 0x238   :  { %v410_v42 = vpop.trf.xlu0 }
 0x239   :  { %427 = vst.msk [vmem:[%s779_s4 + $0x78] sm:$0xff] %vm411_vm5, %v410_v42 }
 0x23a   :  { %577 = dma.done.wait [#allocation4], 16  }
 0x23b   :  { %578 = vsyncadd [#allocation4], 4294967280 }
 0x23c   :  { %445 = vsyncpa [#allocation3], 1 }
 0x23d   :  { %446 = vsyncpa [#allocation6], 1 }
 0x23e   :  { %447 = vsyncpa [#allocation4], 1 }

</bundles_post_ra>
